<compile_context>
chip_gen: v6e
topology: v6e:2x2x1
jax: 0.10.0
libtpu: 0.0.40
codegen_flags: <defaults>
</compile_context>

<pallas_src>
import functools
import math

import jax
import jax.numpy as jnp
from jax import lax
from jax.experimental import pallas as pl
from jax.experimental.pallas import tpu as pltpu

_LANE = 128                      # lane-dense packing width
_LOG_2PI = math.log(2.0 * math.pi)
_TB_MAX = 512                    # max rows per grid step (HBM-roofline friendly)


def _round_up(x, m):
    return ((x + m - 1) // m) * m


def _dim_semantics():
    """CORE_PARALLEL engages v7x's 2nd TensorCore; plain 'parallel' elsewhere."""
    try:
        kind = jax.devices()[0].device_kind.lower()
    except Exception:  # pragma: no cover - defensive only
        kind = ""
    if ("v7" in kind or "7x" in kind) and hasattr(pltpu, "CORE_PARALLEL"):
        return (pltpu.CORE_PARALLEL,)
    return ("parallel",)


def _gac_head_kernel(phi_ref, tid_ref, w_ref, b_ref, sl_ref, car_ref, out_ref,
                     *, action_dim: int, n_tasks: int, sample: bool):
    """Fused actor/critic/Gaussian head for a (TB, D) block of rows.

    Packed layouts (A = action_dim):
      w_ref (D, n_tasks*128), b_ref (1, n_tasks*128):
          cols [t*128 : t*128+A] actor of task t, col t*128+2A critic of task t.
      sl_ref (2, 128): row 0 = softplus(std) padded with 1.0,
                       row 1 = sum(log scale) + A/2*log(2*pi) in every lane.
      car_ref (TB, 128): eps (sample path) or given action, zeros beyond lane A.
      out_ref (TB, 128): [0:A] action, [A:2A] mean, [2A] v, [2A+1] log_pi_a.
    """
    a = action_dim

    # One MXU matmul against the heads of ALL tasks at once:
    #   (TB, D) @ (D, n_tasks*128) -> (TB, n_tasks*128)
    phi = phi_ref[...]
    z_all = (jnp.dot(phi, w_ref[...], preferred_element_type=jnp.float32)
             + b_ref[...])

    # Per-row task selection: VPU where over static, 128-aligned lane segments.
    tid = tid_ref[...]                                   # (TB, 1) int32
    z = z_all[:, 0:_LANE]
    for t in range(1, n_tasks):
        z = jnp.where(tid == t, z_all[:, t * _LANE:(t + 1) * _LANE], z)

    col = lax.broadcasted_iota(jnp.int32, (1, _LANE), 1)
    actor_mask = col < a                                 # (1, 128)
    scale = sl_ref[0:1, :]                               # (1, 128); lanes >= A are 1.0
    logp_const = sl_ref[1:2, :]                          # (1, 128); every lane = const

    mean_vec = jnp.where(actor_mask, jnp.tanh(z), 0.0)   # non-actor lanes -> 0
    carrier = car_ref[...]                               # (TB, 128); lanes >= A are 0
    if sample:
        action_vec = mean_vec + scale * carrier          # reparameterized sample
    else:
        action_vec = carrier                             # caller-provided action

    # Non-actor lanes of diff are exactly 0 (carrier=0, mean=0, scale=1), so the
    # full-width lane sum equals the sum over action dims -- no mask needed.
    diff = (action_vec - mean_vec) / scale
    logp = -0.5 * jnp.sum(diff * diff, axis=-1, keepdims=True)   # (TB, 1)

    # Pack [action | mean | v | log_pi_a] into one lane-dense 128-wide slab.
    out = action_vec                                     # lanes [0, A)
    mean_shift = pltpu.roll(mean_vec, shift=a, axis=1)   # XLU lane rotate (free slot)
    out = jnp.where((col >= a) & (col < 2 * a), mean_shift, out)
    out = jnp.where(col == 2 * a, z, out)                # raw z lane 2A == critic v
    out = jnp.where(col == 2 * a + 1, logp - logp_const, out)
    out_ref[...] = out.astype(out_ref.dtype)


@functools.partial(jax.jit, static_argnames=("action_dim", "n_tasks", "sample", "tb"))
def _gac_forward(phi, task_id, carrier, w_big, b_big, std, *,
                 action_dim, n_tasks, sample, tb):
    bsz, d = phi.shape
    a = action_dim

    # Batch-invariant Gaussian constants hoisted OUT of the kernel (plain XLA).
    scale = jax.nn.softplus(std)                         # (A,)
    log_scale = jnp.log(scale)
    scale_pad = jnp.ones((_LANE,), jnp.float32).at[:a].set(scale)
    logp_const = jnp.sum(log_scale) + a * 0.5 * _LOG_2PI
    sl = jnp.stack([scale_pad,
                    jnp.full((_LANE,), logp_const, jnp.float32)])    # (2, 128)
    ent = jnp.broadcast_to(jnp.sum(0.5 + 0.5 * _LOG_2PI + log_scale), (bsz, 1))

    # Pad the batch to a multiple of the tile so every grid step is full.
    b_pad = _round_up(bsz, tb)
    if b_pad != bsz:
        pad = ((0, b_pad - bsz), (0, 0))
        phi = jnp.pad(phi, pad)
        carrier = jnp.pad(carrier, pad)
        task_id = jnp.pad(task_id, pad)

    kernel = functools.partial(_gac_head_kernel, action_dim=a,
                               n_tasks=n_tasks, sample=sample)
    c = n_tasks * _LANE
    grid_spec = pltpu.PrefetchScalarGridSpec(
        num_scalar_prefetch=0,
        grid=(b_pad // tb,),
        in_specs=[
            pl.BlockSpec((tb, d), lambda i: (i, 0)),        # phi rows (streamed)
            pl.BlockSpec((tb, 1), lambda i: (i, 0)),        # per-row task ids
            pl.BlockSpec((d, c), lambda i: (0, 0)),         # packed weights (resident)
            pl.BlockSpec((1, c), lambda i: (0, 0)),         # packed bias    (resident)
            pl.BlockSpec((2, _LANE), lambda i: (0, 0)),     # scale / logp const (resident)
            pl.BlockSpec((tb, _LANE), lambda i: (i, 0)),    # eps / action carrier
        ],
        out_specs=pl.BlockSpec((tb, _LANE), lambda i: (i, 0)),
    )
    slab = pl.pallas_call(
        kernel,
        out_shape=jax.ShapeDtypeStruct((b_pad, _LANE), jnp.float32),
        grid_spec=grid_spec,
        compiler_params=pltpu.CompilerParams(
            dimension_semantics=_dim_semantics()),
    )(phi, task_id, w_big, b_big, sl, carrier)

    slab = slab[:bsz]
    return {
        'a': slab[:, :a],
        'mean': slab[:, a:2 * a],
        'v': slab[:, 2 * a:2 * a + 1],
        'log_pi_a': slab[:, 2 * a + 1:2 * a + 2],
        'ent': ent,
    }


class GaussianActorCriticNet:
    """JAX/Pallas port of deep_rl GaussianActorCriticNet (default sub-modules)."""

    def __init__(self, n_tasks, state_dim, action_dim, key, w_scale=1e-3):
        # TODO(synk): custom phi_body / actor / critic sub-modules are not
        # translated; only the default DummyBody + MultiLinear heads are.
        assert 2 * action_dim + 2 <= _LANE, "packed output layout needs 2A+2 <= 128"
        self.n_tasks = n_tasks
        self.state_dim = state_dim
        self.action_dim = action_dim
        self.feature_dim = state_dim                      # DummyBody

        ka, kc, kr = jax.random.split(key, 3)
        self.w_actor = (jax.random.normal(ka, (n_tasks, state_dim, action_dim),
                                          jnp.float32) * w_scale)
        self.b_actor = jnp.zeros((n_tasks, action_dim), jnp.float32)
        self.w_critic = (jax.random.normal(kc, (n_tasks, state_dim, 1),
                                           jnp.float32) * w_scale)
        self.b_critic = jnp.zeros((n_tasks, 1), jnp.float32)
        self.std = jnp.zeros((action_dim,), jnp.float32)  # nn.Parameter(zeros)
        self._rng = kr              # stateful fallback key (torch global-RNG analogue)

        # Pack actor + critic heads of ALL tasks into one lane-dense
        # (D, n_tasks*128) slab ONCE: cols [t*128 : t*128+A] actor of task t,
        # col t*128+2A critic of task t, rest zero.  This slab stays VMEM
        # resident inside the kernel (constant index_map).
        a = action_dim
        w_pack = jnp.zeros((n_tasks, state_dim, _LANE), jnp.float32)
        w_pack = w_pack.at[:, :, :a].set(self.w_actor)
        w_pack = w_pack.at[:, :, 2 * a].set(self.w_critic[:, :, 0])
        self._w_big = jnp.transpose(w_pack, (1, 0, 2)).reshape(
            state_dim, n_tasks * _LANE)
        b_pack = jnp.zeros((n_tasks, _LANE), jnp.float32)
        b_pack = b_pack.at[:, :a].set(self.b_actor)
        b_pack = b_pack.at[:, 2 * a].set(self.b_critic[:, 0])
        self._b_big = b_pack.reshape(1, n_tasks * _LANE)

    def forward(self, obs, info, action=None, rng=None, tile_b=None):
        obs = jnp.asarray(obs, jnp.float32)
        phi = obs                                         # DummyBody: identity
        bsz, _ = phi.shape
        a = self.action_dim
        task_id = jnp.asarray(info['task_id'], jnp.int32).reshape(bsz, 1)

        if action is None:
            if rng is None:
                # Mimic torch's stateful global RNG: advance an internal key.
                self._rng, rng = jax.random.split(self._rng)
            payload = jax.random.normal(rng, (bsz, a), jnp.float32)
            sample = True
        else:
            payload = jnp.asarray(action, jnp.float32)
            sample = False
        # 128-lane carrier for eps / given action (lanes >= A are zero).
        carrier = jnp.zeros((bsz, _LANE), jnp.float32).at[:, :a].set(payload)

        # Batch tile: as large as useful up to _TB_MAX.  VMEM per step is
        # ~2*TB*(D + 2*128)*4 bytes of streamed double buffers plus the
        # resident n_tasks*D*128*4-byte weight slab -- well under the 32 MiB
        # default scoped VMEM (and v7x's 64 MiB ceiling) for typical RL sizes.
        if tile_b is None:
            tb = min(_TB_MAX, _round_up(bsz, 8))
        else:
            tb = _round_up(int(tile_b), 8)
        return _gac_forward(phi, task_id, carrier, self._w_big, self._b_big,
                            self.std, action_dim=a, n_tasks=self.n_tasks,
                            sample=sample, tb=int(tb))

    __call__ = forward

    def value(self, obs, info):
        obs = jnp.asarray(obs, jnp.float32)
        dummy = jnp.zeros((obs.shape[0], self.action_dim), jnp.float32)
        return self.forward(obs, info, action=dummy)['v']


def _reference_forward(net, obs, task_id, eps=None, action=None):
    """Pure-JAX reference mirroring the torch forward."""
    phi = jnp.asarray(obs, jnp.float32)
    hp = lax.Precision.HIGHEST
    wa, ba = net.w_actor[task_id], net.b_actor[task_id]
    wc, bc = net.w_critic[task_id], net.b_critic[task_id]
    mean = jnp.tanh(jnp.einsum('bd,bda->ba', phi, wa, precision=hp) + ba)
    v = jnp.einsum('bd,bdo->bo', phi, wc, precision=hp) + bc
    scale = jax.nn.softplus(net.std)
    if action is None:
        action = mean + scale * eps
    logp = (-0.5 * ((action - mean) / scale) ** 2
            - jnp.log(scale) - 0.5 * _LOG_2PI).sum(-1, keepdims=True)
    ent = jnp.broadcast_to((0.5 + 0.5 * _LOG_2PI + jnp.log(scale)).sum(),
                           (phi.shape[0], 1))
    return {'a': action, 'mean': mean, 'v': v, 'log_pi_a': logp, 'ent': ent}


if __name__ == "__main__":
    key = jax.random.PRNGKey(0)
    (k_param, k_obs, k_task, k_eps, k_act,
     k_obs2, k_task2) = jax.random.split(key, 7)

    n_tasks, state_dim, action_dim, batch = 3, 32, 4, 8

    # w_scale larger than the module default (1e-3) so tanh / log_prob are
    # exercised away from the linear region; forward semantics are unchanged.
    net = GaussianActorCriticNet(n_tasks, state_dim, action_dim, k_param,
                                 w_scale=0.5)

    obs = jax.random.normal(k_obs, (batch, state_dim), jnp.float32)
    task_id = jax.random.randint(k_task, (batch,), 0, n_tasks, jnp.int32)
    info = {'task_id': task_id}

    # Path 1: action=None (kernel samples via reparameterization with eps).
    out = jax.block_until_ready(net(obs, info, rng=k_eps))
    eps = jax.random.normal(k_eps, (batch, action_dim), jnp.float32)
    ref = _reference_forward(net, obs, task_id, eps=eps)
    for name in ('a', 'mean', 'v', 'log_pi_a', 'ent'):
        assert out[name].shape == ref[name].shape, name
        assert bool(jnp.allclose(out[name], ref[name], rtol=1e-4, atol=1e-4)), name

    # Path 2: caller-provided action.
    given = jax.random.normal(k_act, (batch, action_dim), jnp.float32)
    out2 = jax.block_until_ready(net(obs, info, action=given))
    ref2 = _reference_forward(net, obs, task_id, action=given)
    for name in ('a', 'mean', 'v', 'log_pi_a', 'ent'):
        assert bool(jnp.allclose(out2[name], ref2[name], rtol=1e-4, atol=1e-4)), name

    # Path 3: multi-step grid + batch padding (batch not a multiple of the tile).
    batch3 = 20
    obs3 = jax.random.normal(k_obs2, (batch3, state_dim), jnp.float32)
    task3 = jax.random.randint(k_task2, (batch3,), 0, n_tasks, jnp.int32)
    given3 = jax.random.normal(k_act, (batch3, action_dim), jnp.float32)
    out3 = jax.block_until_ready(
        net(obs3, {'task_id': task3}, action=given3, tile_b=8))
    ref3 = _reference_forward(net, obs3, task3, action=given3)
    for name in ('a', 'mean', 'v', 'log_pi_a', 'ent'):
        assert bool(jnp.allclose(out3[name], ref3[name], rtol=1e-4, atol=1e-4)), name

    print("KERNEL_OK")
</pallas_src>

<mosaic_0001>
module attributes {stable_mosaic.version = 11 : i64} {
  func.func @_gac_head_kernel(%arg0: i32, %arg1: memref<8x32xf32, #tpu.memory_space<vmem>>, %arg2: memref<8x1xi32, #tpu.memory_space<vmem>>, %arg3: memref<32x384xf32, #tpu.memory_space<vmem>>, %arg4: memref<1x384xf32, #tpu.memory_space<vmem>>, %arg5: memref<2x128xf32, #tpu.memory_space<vmem>>, %arg6: memref<8x128xf32, #tpu.memory_space<vmem>>, %arg7: memref<8x128xf32, #tpu.memory_space<vmem>>) attributes {dimension_semantics = [#tpu.dimension_semantics<parallel>], iteration_bounds = array<i64: 1>, scalar_prefetch = 0 : i64, scratch_operands = 0 : i64, tpu.core_type = #tpu.core_type<tc>, window_params = [{transform_indices = @transform_0, window_bounds = array<i64: 8, 32>}, {transform_indices = @transform_1, window_bounds = array<i64: 8, 1>}, {pipeline_mode = #tpu.pipeline_mode<synchronous>, transform_indices = @transform_2, window_bounds = array<i64: 32, 384>}, {pipeline_mode = #tpu.pipeline_mode<synchronous>, transform_indices = @transform_3, window_bounds = array<i64: 1, 384>}, {pipeline_mode = #tpu.pipeline_mode<synchronous>, transform_indices = @transform_4, window_bounds = array<i64: 2, 128>}, {transform_indices = @transform_5, window_bounds = array<i64: 8, 128>}, {transform_indices = @transform_6, window_bounds = array<i64: 8, 128>}]} {
    %c0 = arith.constant 0 : index
    %c0_0 = arith.constant 0 : index
    %0 = vector.load %arg1[%c0, %c0_0] : memref<8x32xf32, #tpu.memory_space<vmem>>, vector<8x32xf32>
    %c0_1 = arith.constant 0 : index
    %c0_2 = arith.constant 0 : index
    %1 = vector.load %arg3[%c0_1, %c0_2] : memref<32x384xf32, #tpu.memory_space<vmem>>, vector<32x384xf32>
    %cst = arith.constant dense<0.000000e+00> : vector<8x384xf32>
    %2 = tpu.matmul %0, %1, %cst {dimension_numbers = #tpu.dot_dimension_numbers<[1], [0], [0], [1], [0, 0, 1, 1], [], []>} : vector<8x32xf32>, vector<32x384xf32>, vector<8x384xf32> -> vector<8x384xf32>
    %c0_3 = arith.constant 0 : index
    %c0_4 = arith.constant 0 : index
    %3 = vector.load %arg4[%c0_3, %c0_4] : memref<1x384xf32, #tpu.memory_space<vmem>>, vector<1x384xf32>
    %4 = vector.broadcast %3 : vector<1x384xf32> to vector<8x384xf32>
    %5 = arith.addf %2, %4 : vector<8x384xf32>
    %c0_5 = arith.constant 0 : index
    %c0_6 = arith.constant 0 : index
    %6 = vector.load %arg2[%c0_5, %c0_6] : memref<8x1xi32, #tpu.memory_space<vmem>>, vector<8x1xi32>
    %7 = vector.extract_strided_slice %5 {offsets = [0, 0], sizes = [8, 128], strides = [1, 1]} : vector<8x384xf32> to vector<8x128xf32>
    %c1_i32 = arith.constant 1 : i32
    %8 = vector.broadcast %c1_i32 : i32 to vector<8x1xi32>
    %9 = arith.cmpi eq, %6, %8 : vector<8x1xi32>
    %10 = vector.extract_strided_slice %5 {offsets = [0, 128], sizes = [8, 128], strides = [1, 1]} : vector<8x384xf32> to vector<8x128xf32>
    %11 = vector.shape_cast %9 : vector<8x1xi1> to vector<8x1xi1>
    %12 = vector.broadcast %11 : vector<8x1xi1> to vector<8x128xi1>
    %13 = arith.select %12, %10, %7 : vector<8x128xi1>, vector<8x128xf32>
    %c2_i32 = arith.constant 2 : i32
    %14 = vector.broadcast %c2_i32 : i32 to vector<8x1xi32>
    %15 = arith.cmpi eq, %6, %14 : vector<8x1xi32>
    %16 = vector.extract_strided_slice %5 {offsets = [0, 256], sizes = [8, 128], strides = [1, 1]} : vector<8x384xf32> to vector<8x128xf32>
    %17 = vector.shape_cast %15 : vector<8x1xi1> to vector<8x1xi1>
    %18 = vector.broadcast %17 : vector<8x1xi1> to vector<8x128xi1>
    %19 = arith.select %18, %16, %13 : vector<8x128xi1>, vector<8x128xf32>
    %20 = tpu.iota {dimensions = array<i32: 1>} : vector<1x128xi32>
    %c4_i32 = arith.constant 4 : i32
    %21 = vector.broadcast %c4_i32 : i32 to vector<1x128xi32>
    %22 = arith.cmpi slt, %20, %21 : vector<1x128xi32>
    %c0_7 = arith.constant 0 : index
    %c0_8 = arith.constant 0 : index
    %23 = vector.load %arg5[%c0_7, %c0_8] : memref<2x128xf32, #tpu.memory_space<vmem>>, vector<1x128xf32>
    %c1 = arith.constant 1 : index
    %c0_9 = arith.constant 0 : index
    %24 = vector.load %arg5[%c1, %c0_9] : memref<2x128xf32, #tpu.memory_space<vmem>>, vector<1x128xf32>
    %25 = math.tanh %19 : vector<8x128xf32>
    %cst_10 = arith.constant 0.000000e+00 : f32
    %26 = vector.shape_cast %22 : vector<1x128xi1> to vector<1x128xi1>
    %27 = vector.broadcast %26 : vector<1x128xi1> to vector<8x128xi1>
    %28 = vector.broadcast %cst_10 : f32 to vector<8x128xf32>
    %29 = arith.select %27, %25, %28 : vector<8x128xi1>, vector<8x128xf32>
    %c0_11 = arith.constant 0 : index
    %c0_12 = arith.constant 0 : index
    %30 = vector.load %arg6[%c0_11, %c0_12] : memref<8x128xf32, #tpu.memory_space<vmem>>, vector<8x128xf32>
    %31 = vector.broadcast %23 : vector<1x128xf32> to vector<8x128xf32>
    %32 = arith.mulf %31, %30 : vector<8x128xf32>
    %33 = arith.addf %29, %32 : vector<8x128xf32>
    %34 = arith.subf %33, %29 : vector<8x128xf32>
    %35 = vector.broadcast %23 : vector<1x128xf32> to vector<8x128xf32>
    %36 = arith.divf %34, %35 : vector<8x128xf32>
    %37 = arith.mulf %36, %36 : vector<8x128xf32>
    %cst_13 = arith.constant dense<0.000000e+00> : vector<8xf32>
    %38 = vector.multi_reduction <add>, %37, %cst_13 [1] : vector<8x128xf32> to vector<8xf32>
    %39 = vector.shape_cast %38 : vector<8xf32> to vector<8x1xf32>
    %cst_14 = arith.constant -5.000000e-01 : f32
    %40 = vector.broadcast %cst_14 : f32 to vector<8x1xf32>
    %41 = arith.mulf %40, %39 : vector<8x1xf32>
    %c4_i32_15 = arith.constant 4 : i32
    %42 = tpu.dynamic_rotate %29 by %c4_i32_15 dim 1 : vector<8x128xf32>, i32 -> vector<8x128xf32>
    %c4_i32_16 = arith.constant 4 : i32
    %43 = vector.broadcast %c4_i32_16 : i32 to vector<1x128xi32>
    %44 = arith.cmpi sge, %20, %43 : vector<1x128xi32>
    %c8_i32 = arith.constant 8 : i32
    %45 = vector.broadcast %c8_i32 : i32 to vector<1x128xi32>
    %46 = arith.cmpi slt, %20, %45 : vector<1x128xi32>
    %47 = arith.andi %44, %46 : vector<1x128xi1>
    %48 = vector.shape_cast %47 : vector<1x128xi1> to vector<1x128xi1>
    %49 = vector.broadcast %48 : vector<1x128xi1> to vector<8x128xi1>
    %50 = arith.select %49, %42, %33 : vector<8x128xi1>, vector<8x128xf32>
    %c8_i32_17 = arith.constant 8 : i32
    %51 = vector.broadcast %c8_i32_17 : i32 to vector<1x128xi32>
    %52 = arith.cmpi eq, %20, %51 : vector<1x128xi32>
    %53 = vector.shape_cast %52 : vector<1x128xi1> to vector<1x128xi1>
    %54 = vector.broadcast %53 : vector<1x128xi1> to vector<8x128xi1>
    %55 = arith.select %54, %19, %50 : vector<8x128xi1>, vector<8x128xf32>
    %c9_i32 = arith.constant 9 : i32
    %56 = vector.broadcast %c9_i32 : i32 to vector<1x128xi32>
    %57 = arith.cmpi eq, %20, %56 : vector<1x128xi32>
    %58 = vector.broadcast %41 : vector<8x1xf32> to vector<8x128xf32>
    %59 = vector.broadcast %24 : vector<1x128xf32> to vector<8x128xf32>
    %60 = arith.subf %58, %59 : vector<8x128xf32>
    %61 = vector.shape_cast %57 : vector<1x128xi1> to vector<1x128xi1>
    %62 = vector.broadcast %61 : vector<1x128xi1> to vector<8x128xi1>
    %63 = arith.select %62, %60, %55 : vector<8x128xi1>, vector<8x128xf32>
    %c0_18 = arith.constant 0 : index
    %c0_19 = arith.constant 0 : index
    %64 = vector.load %arg7[%c0_18, %c0_19] : memref<8x128xf32, #tpu.memory_space<vmem>>, vector<8x128xf32>
    tpu.vector_store %arg7[%c0_18, %c0_19], %63 {strides = array<i32>} : memref<8x128xf32, #tpu.memory_space<vmem>>, vector<8x128xf32>,
    return
  }
  func.func @transform_0(%arg0: i32) -> (i32, i32) {
    %c0_i32 = arith.constant 0 : i32
    %c0_i32_0 = arith.constant 0 : i32
    return %arg0, %c0_i32 : i32, i32
  }
  func.func @transform_1(%arg0: i32) -> (i32, i32) {
    %c0_i32 = arith.constant 0 : i32
    %c0_i32_0 = arith.constant 0 : i32
    return %arg0, %c0_i32 : i32, i32
  }
  func.func @transform_2(%arg0: i32) -> (i32, i32) {
    %c0_i32 = arith.constant 0 : i32
    %c0_i32_0 = arith.constant 0 : i32
    %c0_i32_1 = arith.constant 0 : i32
    return %c0_i32, %c0_i32_0 : i32, i32
  }
  func.func @transform_3(%arg0: i32) -> (i32, i32) {
    %c0_i32 = arith.constant 0 : i32
    %c0_i32_0 = arith.constant 0 : i32
    %c0_i32_1 = arith.constant 0 : i32
    return %c0_i32, %c0_i32_0 : i32, i32
  }
  func.func @transform_4(%arg0: i32) -> (i32, i32) {
    %c0_i32 = arith.constant 0 : i32
    %c0_i32_0 = arith.constant 0 : i32
    %c0_i32_1 = arith.constant 0 : i32
    return %c0_i32, %c0_i32_0 : i32, i32
  }
  func.func @transform_5(%arg0: i32) -> (i32, i32) {
    %c0_i32 = arith.constant 0 : i32
    %c0_i32_0 = arith.constant 0 : i32
    return %arg0, %c0_i32 : i32, i32
  }
  func.func @transform_6(%arg0: i32) -> (i32, i32) {
    %c0_i32 = arith.constant 0 : i32
    %c0_i32_0 = arith.constant 0 : i32
    return %arg0, %c0_i32 : i32, i32
  }
}

</mosaic_0001>

<bundles_post_ra>
// kernel: _gac_forward.1
= control target key start
LH: loop header
LB: loop body
LE: loop exit
PB: predicated region body
PF: predicated region fallthrough
CT: control target
= control target key end

     0   :  { %11 = vsyncpa [#allocation3], 0  ;;  %s331_s21 = smov [#allocation2]   ;;  %s397_s0 = inlined_call_operand.vmem [shape: f32[8,32], index: 0, kind: input, shape index: {}]   ;;  %s398_s1 = inlined_call_operand.vmem [shape: s32[8,1], index: 1, kind: input, shape index: {}]   ;;  %s399_s2 = inlined_call_operand.hbm [shape: f32[32,384], index: 2, kind: input, shape index: {}]   ;;  %s400_s3 = inlined_call_operand.vmem [shape: f32[1,384], index: 3, kind: input, shape index: {}]   ;;  %s401_s4 = inlined_call_operand.vmem [shape: f32[2,128], index: 4, kind: input, shape index: {}]   ;;  %s402_s5 = inlined_call_operand.vmem [shape: f32[8,128], index: 5, kind: input, shape index: {}]   ;;  %s403_s6 = inlined_call_operand.vmem [shape: f32[8,128], index: 6, kind: output, shape index: {}]  }
   0x1   :  { %s21_s22 = sshll.u32 %s331_s21, 4  ;;  %s22_s22 = int_to_ptr.vmem [resolvable:$true] %s21_s22 }
   0x2   :  { %s317_s23 = scalar_lea.vmem %s22_s22, 1536  ;;  %p322_p1 = scmp.lt.s32.totalorder %s22_s22, %s22_s22 }
   0x3   :  { %p318_p0 = scmp.ne.s32.totalorder %s22_s22, %s317_s23  ;;  %p323_p2 = scmp.lt.s32.totalorder %s317_s23, %s317_s23 }
   0x5   :  { %p324_p3 = por %p323_p2, %p322_p1 }
   0x7   :  { %p325_p4 = pnand %p324_p3, %p318_p0 }
   0x9   :  { %328 = shalt.err (!%p325_p4)
}
   0xa   :  { %s332_s24 = smov 384   ;;  %s333_s25 = smov 24  }
   0xb   :  { %27 = dma.hbm_to_vmem [thread:$0]  %s399_s2, 1536, %s22_s22, [#allocation3], %s332_s24, %s332_s24, %s333_s25  }
   0xc   :  { %329 = dma.done.wait [#allocation3], 1536  }
   0xd   :  { %330 = vsyncadd [#allocation3], 4294965760  ;;  %v334_v0 = vmov 0.0   ;;  %vm335_vm0 = vmmov 0   ;;  %v336_v1 = vmov 0   ;;  %v48_v2 = vld [vmem:[#allocation2 + $0x50] sm:$0xff]  ;;  %v52_v18 = vlaneseq }
   0xe   :  { %286 = vmatprep.subr.mxu1 %v334_v0  ;;  %135 = vmatprep.mubr.f32.mxu0 %v334_v0  ;;  %v47_v3 = vld [vmem:[#allocation2 + $0x48] sm:$0xff]  ;;  %v45_v4 = vld [vmem:[#allocation2 + $0x38] sm:$0xff]  ;;  %v44_v6 = vld [vmem:[#allocation2 + $0x30] sm:$0xff]  ;;  %vm67_vm2 = vcmask 261120   ;;  %s337_s10 = smov 4  }
   0xf   :  { %294 = vmatprep.mubr.msk.f32.mxu1 %vm335_vm0, %v334_v0  ;;  %304 = vset.pattern.permute.xlu0 %v336_v1  ;;  %v49_v5 = vld [vmem:[#allocation2 + $0x58] sm:$0xff]  ;;  %v42_v7 = vld [vmem:[#allocation2 + $0x20] sm:$0xff]  ;;  %v43_v10 = vld [vmem:[#allocation2 + $0x28] sm:$0xff]  ;;  %v53_v19 = vshrl.u32 %v52_v18, 7  ;;  %v228_v39 = vand.u32 127, %v52_v18 }
  0x10   :  { %95 = vmatprep.subr.mxu0 %v48_v2  ;;  %287 = vmatpush3.msra.mxu1 %v49_v5  ;;  %v46_v8 = vld [vmem:[#allocation2 + $0x40] sm:$0xff]  ;;  %v41_v9 = vld [vmem:[#allocation2 + $0x18] sm:$0xff]  ;;  %v39_v11 = vld [vmem:[#allocation2 + $0x8] sm:$0xff] }
  0x11   :  { %96 = vmatpush1.msra.mxu0 %v47_v3  ;;  %288 = vmatprep.subr.mxu1 %v334_v0  ;;  %v212_v12 = vld [vmem:[%s398_s1] sm:$0xff]  ;;  %v40_v14 = vld [vmem:[#allocation2 + $0x10] sm:$0xff]  ;;  %v62_v20 = vsub.s32 2, %v53_v19  ;;  %v54_v22 = vsub.s32 0, %v53_v19  ;;  %v58_v23 = vsub.s32 1, %v53_v19  ;;  %vm229_vm6 = vcmp.lt.s32.totalorder %v228_v39, 4 }
  0x12   :  { %97 = vmatprep.subr.mxu0 %v45_v4  ;;  %289 = vmatpush3.msra.mxu1 %v46_v8  ;;  %v38_v13 = vld [vmem:[#allocation2] sm:$0xff]  ;;  %vm213_vm1 = vcmp.eq.s32.totalorder %v212_v12, 1  ;;  %vm220_vm3 = vcmp.eq.s32.totalorder %v212_v12, 2  ;;  %vm252_vm7 = vcmp.ge.s32.totalorder %v228_v39, 4  ;;  %vm253_vm8 = vcmp.lt.s32.totalorder %v228_v39, 8 }
  0x13   :  { %98 = vmatpush1.msra.mxu0 %v44_v6  ;;  %290 = vmatprep.subr.mxu1 %v334_v0  ;;  %v37_v15 = vld [vmem:[%s397_s0] sm:$0xff]  ;;  %v214_v16 = vsel %vm213_vm1, 1, %v336_v1  ;;  %v221_v17 = vsel %vm220_vm3, 1, %v336_v1  ;;  %vm254_vm9 = vmand %vm252_vm7, %vm253_vm8  ;;  %vm258_vm10 = vcmp.eq.s32.totalorder %v228_v39, 8  ;;  %vm262_vm11 = vcmp.eq.s32.totalorder %v228_v39, 9 }
  0x14   :  { %99 = vmatprep.subr.mxu0 %v42_v7  ;;  %291 = vmatpush3.msra.mxu1 %v43_v10  ;;  %v50_v24 = vld [vmem:[%s400_s3] sm:$0x7] }
  0x15   :  { %100 = vmatpush1.msra.mxu0 %v41_v9  ;;  %292 = vmatprep.subr.mxu1 %v334_v0  ;;  %v63_v25 = vrot.slane %v50_v24, %v62_v20  ;;  %v55_v26 = vrot.slane %v50_v24, %v54_v22  ;;  %v59_v27 = vrot.slane %v50_v24, %v58_v23  ;;  %v279_v38 = vld [vmem:[%s401_s4] ss:$0 sm:$0xff]  ;;  %v280_v51 = vld [vmem:[%s401_s4 + $0x1] ss:$0 sm:$0xff] }
  0x16   :  { %101 = vmatprep.subr.mxu0 %v39_v11  ;;  %293 = vmatpush3.msra.mxu1 %v40_v14  ;;  %v236_v40 = vld [vmem:[%s402_s5] sm:$0xff] }
  0x17   :  { %102 = vmatpush1.msra.mxu0 %v38_v13  ;;  %295 = vmatmul.mubr.msk.f32.vlgmr.msra.gmra.mxu1 %vm67_vm2, %v37_v15  ;;  %v241_v41 = vmul.f32 %v279_v38, %v236_v40 }
  0x18   :  { %277 = vmatmul.mubr.msk.f32.vlgmr.msra.gmra.mxu0 %vm67_vm2, %v37_v15  ;;  %216 = vperm.xlu0 %304, %v214_v16  }
  0x1c   :  { %223 = vperm.xlu0 %304, %v221_v17  }
  0x93   :  { %v217_v21 = vpop.permute.xlu0 %216 }
  0x94   :  { %vm218_vm4 = vcmp.eq.s32.totalorder %v217_v21, 1 }
  0x97   :  { %v224_v30 = vpop.permute.xlu0 %223 }
  0x98   :  { %vm225_vm5 = vcmp.eq.s32.totalorder %v224_v30, 1 }
  0xd7   :  { %v208_v29 = vpop.f32.mrf.mxu1 }
  0xd8   :  { %v137_v28 = vpop.f32.mrf.mxu0  ;;  %v209_v31 = vadd.f32 %v208_v29, %v63_v25 }
  0xd9   :  { %v296_v33 = vpop.f32.mrf.mxu1  ;;  %v138_v34 = vadd.f32 %v137_v28, %v55_v26 }
  0xda   :  { %v139_v32 = vpop.f32.mrf.mxu0 }
  0xdb   :  { %v140_v35 = vadd.f32 %v139_v32, %v59_v27 }
  0xdd   :  { %v219_v36 = vsel %vm218_vm4, %v140_v35, %v138_v34 }
  0xde   :  { %v226_v37 = vsel %vm225_vm5, %v209_v31, %v219_v36 }
  0xdf   :  { %305 = vtanh.f32 %v226_v37 }
  0xe0   :  { %307 = vrcp.f32 %v279_v38 }
  0xec   :  { %v306_v42 = vpop.eup %305 }
  0xed   :  { %v235_v43 = vsel %vm229_vm6, %v306_v42, 0.0  ;;  %v308_v45 = vpop.eup %307 }
  0xee   :  { %v242_v44 = vadd.f32 %v241_v41, %v235_v43 }
  0xf0   :  { %v243_v46 = vsub.f32 %v242_v44, %v235_v43 }
  0xf2   :  { %v245_v47 = vmul.f32 %v308_v45, %v243_v46 }
  0xf4   :  { %v246_v48 = vmul.f32 %v245_v47, %v245_v47 }
  0xf6   :  { %247 = vadd.xlane.f32.xlu1 %v246_v48 }
 0x107   :  { %250 = vrot.lane.b32.xlu1 %v235_v43, %s337_s10 }
 0x17f   :  { %v248_v49 = vpop.xlane.xlu1 %247 }
 0x180   :  { %v249_v50 = vmul.f32 -0.5, %v248_v49 }
 0x182   :  { %v267_v53 = vsub.f32 %v249_v50, %v280_v51 }
 0x183   :  { %v251_v52 = vpop.permute.xlu1 %250 }
 0x184   :  { %v257_v54 = vsel %vm254_vm9, %v251_v52, %v242_v44 }
 0x185   :  { %v261_v55 = vsel %vm258_vm10, %v226_v37, %v257_v54 }
 0x186   :  { %v270_v56 = vsel %vm262_vm11, %v267_v53, %v261_v55 }
 0x187   :  { %271 = vst [vmem:[%s403_s6] sm:$0xff] %v270_v56 }
 0x188   :  { %276 = vsyncpa [#allocation3], 1 }

</bundles_post_ra>
